<compile_context>
chip_gen: v6e
topology: v6e:2x2x1
jax: 0.10.0
libtpu: 0.0.40
codegen_flags: <defaults>
</compile_context>

<pallas_src>
import jax
import jax.numpy as jnp
from jax.experimental import pallas as pl
from jax.experimental.pallas import tpu as pltpu

ENCODER_DIM = 768   # fixed by the PyTorch module (encoder_dim = 768)
LANE = 128
ROW_MULT = 16       # bf16 sublane packing: keep row tiles multiples of 16


def _round_up(x, m):
    return (x + m - 1) // m * m


# ----------------------------------------------------------------------------
# Fused kernel:
#   hidden = gelu(x @ w_enc + b_enc)        (synthetic wav2vec2 stand-in)
#   out    = hidden @ [w1 | w2]_pad128 + [b1 | b2]_pad128
# bf16 MXU operands, f32 accumulation, f32 bias add + GELU (safe on v5e which
# has no bf16 VPU/EUP), bf16 lane-dense store.
# TODO(synk): the real pretrained wav2vec2 transformer stack is an externally
# injected module; it is replaced by a deterministic Linear(F,768)+GELU
# projection so only the multi-task-head math defined by MultiTaskWav2Vec2
# is exact.  (GELU belongs to the stand-in; the real fc1/fc2 heads are pure
# Linear layers.)
# ----------------------------------------------------------------------------
def _fused_kernel(x_ref, we_ref, be_ref, wh_ref, bh_ref, o_ref):
    # Encoder projection: bf16 x bf16 -> f32 accumulate on the MXU.
    h = jnp.dot(x_ref[...], we_ref[...], preferred_element_type=jnp.float32)
    h = jax.nn.gelu(h + be_ref[...])
    # Both task heads as ONE lane-dense [768, 128] matmul (unmasked vst path).
    o = (
        jnp.dot(h.astype(jnp.bfloat16), wh_ref[...],
                preferred_element_type=jnp.float32)
        + bh_ref[...]
    )
    o_ref[...] = o.astype(o_ref.dtype)


def multitask_wav2vec2_forward(mfcc, params, num_classes_task1,
                               num_classes_task2, *, tm=2048):
    """mfcc: [B, T, F] float32 -> (out_task1 [B,T,C1], out_task2 [B,T,C2])."""
    B, T, F = mfcc.shape
    D = ENCODER_DIM
    C1, C2 = num_classes_task1, num_classes_task2
    C = C1 + C2
    Cpad = params["w_head"].shape[1]

    M = B * T
    # bf16 activations: halves x HBM traffic and uses native bf16 MXU passes.
    x2d = mfcc.reshape(M, F).astype(jnp.bfloat16)

    # Row tile: as large as tm for MXU utilization / per-step overhead
    # amortization, but capped near M/2 so realistic inputs produce >= 2 grid
    # steps (v7x: 2 TensorCores share the "parallel" grid axis).
    tm_eff = max(ROW_MULT, min(tm, _round_up(pl.cdiv(M, 2), ROW_MULT)))
    # No host-side padding: Pallas masks the final partial block.
    grid = (pl.cdiv(M, tm_eff),)

    # Advisory cost estimate so XLA schedules the custom call sensibly.
    flops = 2 * M * F * D + 2 * M * D * Cpad
    bytes_accessed = 2 * (M * F + F * D + D * Cpad + M * Cpad) + 4 * (D + Cpad)
    cost = pl.CostEstimate(
        flops=flops, transcendentals=M * D, bytes_accessed=bytes_accessed
    )

    out = pl.pallas_call(
        _fused_kernel,
        out_shape=jax.ShapeDtypeStruct((M, Cpad), jnp.bfloat16),
        grid_spec=pltpu.PrefetchScalarGridSpec(
            num_scalar_prefetch=0,
            grid=grid,
            in_specs=[
                pl.BlockSpec((tm_eff, F), lambda i: (i, 0)),
                # Constant index_map -> weight/bias blocks stay VMEM-resident
                # across grid steps (activation-streaming pipeline).
                pl.BlockSpec((F, D), lambda i: (0, 0)),
                pl.BlockSpec((1, D), lambda i: (0, 0)),
                pl.BlockSpec((D, Cpad), lambda i: (0, 0)),
                pl.BlockSpec((1, Cpad), lambda i: (0, 0)),
            ],
            out_specs=pl.BlockSpec((tm_eff, Cpad), lambda i: (i, 0)),
        ),
        compiler_params=pltpu.CompilerParams(
            dimension_semantics=("parallel",),
            # Headroom for large row tiles (f32 hidden intermediate + double
            # buffered in/out tiles); <= physical VMEM on every generation.
            vmem_limit_bytes=64 * 1024 * 1024,
        ),
        cost_estimate=cost,
    )(x2d, params["w_enc"], params["b_enc"], params["w_head"], params["b_head"])

    o1 = out[:, :C1].astype(jnp.float32).reshape(B, T, C1)
    o2 = out[:, C1:C].astype(jnp.float32).reshape(B, T, C2)
    return o1, o2


def init_params(key, feat_dim, num_classes_task1, num_classes_task2):
    """Builds params; the fc1|fc2 head weights are concatenated and 128-padded
    ONCE here (not on every forward call)."""
    k = jax.random.split(key, 6)
    D = ENCODER_DIM
    C1, C2 = num_classes_task1, num_classes_task2
    C = C1 + C2
    Cpad = _round_up(C, LANE)

    scale_enc = 1.0 / jnp.sqrt(jnp.float32(feat_dim))
    scale_fc = 1.0 / jnp.sqrt(jnp.float32(D))

    # fc1 / fc2 (weights stored transposed: [D, C])
    w1 = jax.random.normal(k[2], (D, C1), jnp.float32) * scale_fc
    b1 = jax.random.normal(k[3], (C1,), jnp.float32) * scale_fc
    w2 = jax.random.normal(k[4], (D, C2), jnp.float32) * scale_fc
    b2 = jax.random.normal(k[5], (C2,), jnp.float32) * scale_fc

    w_head = (
        jnp.zeros((D, Cpad), jnp.float32).at[:, :C1].set(w1).at[:, C1:C].set(w2)
    )
    b_head = (
        jnp.zeros((1, Cpad), jnp.float32).at[0, :C1].set(b1).at[0, C1:C].set(b2)
    )

    return {
        # Synthetic encoder stand-in: Linear(F, 768) + GELU (see TODO above).
        "w_enc": (jax.random.normal(k[0], (feat_dim, D), jnp.float32)
                  * scale_enc).astype(jnp.bfloat16),
        "b_enc": jax.random.normal(k[1], (1, D), jnp.float32) * 0.01,
        "w_head": w_head.astype(jnp.bfloat16),   # bf16 MXU operand
        "b_head": b_head,                        # f32 bias, added post-accumulate
    }


if __name__ == "__main__":
    B, T, F = 2, 64, 32         # small batch / seq / mfcc-feature dims
    C1, C2 = 10, 5              # num_classes_task1, num_classes_task2

    key = jax.random.PRNGKey(0)
    k_in, k_par = jax.random.split(key)
    mfcc = jax.random.normal(k_in, (B, T, F), jnp.float32)
    params = init_params(k_par, F, C1, C2)

    fwd = jax.jit(multitask_wav2vec2_forward, static_argnums=(2, 3))
    out1, out2 = fwd(mfcc, params, C1, C2)
    jax.block_until_ready(out1)
    jax.block_until_ready(out2)

    # Cross-check against plain JAX using the SAME bf16-in / f32-accumulate
    # recipe (tolerances loosened accordingly).
    # TODO(synk): jax.nn.gelu defaults to the tanh approximation (PyTorch
    # nn.GELU defaults to exact erf); both the kernel and this reference use
    # the tanh form, and the GELU is only part of the synthetic encoder anyway.
    M = B * T
    x_bf = mfcc.reshape(M, F).astype(jnp.bfloat16)
    h_ref = jax.nn.gelu(
        jnp.dot(x_bf, params["w_enc"], preferred_element_type=jnp.float32)
        + params["b_enc"]
    )
    full_ref = (
        jnp.dot(h_ref.astype(jnp.bfloat16), params["w_head"],
                preferred_element_type=jnp.float32)
        + params["b_head"]
    ).astype(jnp.bfloat16).astype(jnp.float32)
    ref1 = full_ref[:, :C1].reshape(B, T, C1)
    ref2 = full_ref[:, C1:C1 + C2].reshape(B, T, C2)

    assert out1.shape == (B, T, C1) and out2.shape == (B, T, C2)
    assert jnp.allclose(out1, ref1, atol=2e-2, rtol=2e-2)
    assert jnp.allclose(out2, ref2, atol=2e-2, rtol=2e-2)

    print("KERNEL_OK")
</pallas_src>

<mosaic_0001>
module attributes {stable_mosaic.version = 11 : i64} {
  func.func @_fused_kernel(%arg0: i32, %arg1: memref<64x32xbf16, #tpu.memory_space<vmem>>, %arg2: memref<32x768xbf16, #tpu.memory_space<vmem>>, %arg3: memref<1x768xf32, #tpu.memory_space<vmem>>, %arg4: memref<768x128xbf16, #tpu.memory_space<vmem>>, %arg5: memref<1x128xf32, #tpu.memory_space<vmem>>, %arg6: memref<64x128xbf16, #tpu.memory_space<vmem>>) attributes {dimension_semantics = [#tpu.dimension_semantics<parallel>], iteration_bounds = array<i64: 2>, scalar_prefetch = 0 : i64, scratch_operands = 0 : i64, tpu.core_type = #tpu.core_type<tc>, window_params = [{transform_indices = @transform_0, window_bounds = array<i64: 64, 32>}, {pipeline_mode = #tpu.pipeline_mode<synchronous>, transform_indices = @transform_1, window_bounds = array<i64: 32, 768>}, {pipeline_mode = #tpu.pipeline_mode<synchronous>, transform_indices = @transform_2, window_bounds = array<i64: 1, 768>}, {pipeline_mode = #tpu.pipeline_mode<synchronous>, transform_indices = @transform_3, window_bounds = array<i64: 768, 128>}, {pipeline_mode = #tpu.pipeline_mode<synchronous>, transform_indices = @transform_4, window_bounds = array<i64: 1, 128>}, {transform_indices = @transform_5, window_bounds = array<i64: 64, 128>}]} {
    %c0 = arith.constant 0 : index
    %c0_0 = arith.constant 0 : index
    %0 = vector.load %arg1[%c0, %c0_0] : memref<64x32xbf16, #tpu.memory_space<vmem>>, vector<64x32xbf16>
    %c0_1 = arith.constant 0 : index
    %c0_2 = arith.constant 0 : index
    %1 = vector.load %arg2[%c0_1, %c0_2] : memref<32x768xbf16, #tpu.memory_space<vmem>>, vector<32x768xbf16>
    %cst = arith.constant dense<0.000000e+00> : vector<64x768xf32>
    %2 = tpu.matmul %0, %1, %cst {dimension_numbers = #tpu.dot_dimension_numbers<[1], [0], [0], [1], [0, 0, 1, 1], [], []>} : vector<64x32xbf16>, vector<32x768xbf16>, vector<64x768xf32> -> vector<64x768xf32>
    %c0_3 = arith.constant 0 : index
    %c0_4 = arith.constant 0 : index
    %3 = vector.load %arg3[%c0_3, %c0_4] : memref<1x768xf32, #tpu.memory_space<vmem>>, vector<1x768xf32>
    %4 = vector.broadcast %3 : vector<1x768xf32> to vector<64x768xf32>
    %5 = arith.addf %2, %4 : vector<64x768xf32>
    %6 = arith.mulf %5, %5 : vector<64x768xf32>
    %7 = arith.mulf %5, %6 : vector<64x768xf32>
    %cst_5 = arith.constant 4.471500e-02 : f32
    %8 = vector.broadcast %cst_5 : f32 to vector<64x768xf32>
    %9 = arith.mulf %8, %7 : vector<64x768xf32>
    %10 = arith.addf %5, %9 : vector<64x768xf32>
    %cst_6 = arith.constant 0.797884583 : f32
    %11 = vector.broadcast %cst_6 : f32 to vector<64x768xf32>
    %12 = arith.mulf %11, %10 : vector<64x768xf32>
    %13 = math.tanh %12 : vector<64x768xf32>
    %cst_7 = arith.constant 1.000000e+00 : f32
    %14 = vector.broadcast %cst_7 : f32 to vector<64x768xf32>
    %15 = arith.addf %14, %13 : vector<64x768xf32>
    %cst_8 = arith.constant 5.000000e-01 : f32
    %16 = vector.broadcast %cst_8 : f32 to vector<64x768xf32>
    %17 = arith.mulf %16, %15 : vector<64x768xf32>
    %18 = arith.mulf %5, %17 : vector<64x768xf32>
    %19 = arith.truncf %18 : vector<64x768xf32> to vector<64x768xbf16>
    %c0_9 = arith.constant 0 : index
    %c0_10 = arith.constant 0 : index
    %20 = vector.load %arg4[%c0_9, %c0_10] : memref<768x128xbf16, #tpu.memory_space<vmem>>, vector<768x128xbf16>
    %cst_11 = arith.constant dense<0.000000e+00> : vector<64x128xf32>
    %21 = tpu.matmul %19, %20, %cst_11 {dimension_numbers = #tpu.dot_dimension_numbers<[1], [0], [0], [1], [0, 0, 1, 1], [], []>} : vector<64x768xbf16>, vector<768x128xbf16>, vector<64x128xf32> -> vector<64x128xf32>
    %c0_12 = arith.constant 0 : index
    %c0_13 = arith.constant 0 : index
    %22 = vector.load %arg5[%c0_12, %c0_13] : memref<1x128xf32, #tpu.memory_space<vmem>>, vector<1x128xf32>
    %23 = vector.broadcast %22 : vector<1x128xf32> to vector<64x128xf32>
    %24 = arith.addf %21, %23 : vector<64x128xf32>
    %25 = arith.truncf %24 : vector<64x128xf32> to vector<64x128xbf16>
    %c0_14 = arith.constant 0 : index
    %c0_15 = arith.constant 0 : index
    %26 = vector.load %arg6[%c0_14, %c0_15] : memref<64x128xbf16, #tpu.memory_space<vmem>>, vector<64x128xbf16>
    tpu.vector_store %arg6[%c0_14, %c0_15], %25 {strides = array<i32>} : memref<64x128xbf16, #tpu.memory_space<vmem>>, vector<64x128xbf16>,
    return
  }
  func.func @transform_0(%arg0: i32) -> (i32, i32) {
    %c0_i32 = arith.constant 0 : i32
    %c0_i32_0 = arith.constant 0 : i32
    return %arg0, %c0_i32 : i32, i32
  }
  func.func @transform_1(%arg0: i32) -> (i32, i32) {
    %c0_i32 = arith.constant 0 : i32
    %c0_i32_0 = arith.constant 0 : i32
    %c0_i32_1 = arith.constant 0 : i32
    return %c0_i32, %c0_i32_0 : i32, i32
  }
  func.func @transform_2(%arg0: i32) -> (i32, i32) {
    %c0_i32 = arith.constant 0 : i32
    %c0_i32_0 = arith.constant 0 : i32
    %c0_i32_1 = arith.constant 0 : i32
    return %c0_i32, %c0_i32_0 : i32, i32
  }
  func.func @transform_3(%arg0: i32) -> (i32, i32) {
    %c0_i32 = arith.constant 0 : i32
    %c0_i32_0 = arith.constant 0 : i32
    %c0_i32_1 = arith.constant 0 : i32
    return %c0_i32, %c0_i32_0 : i32, i32
  }
  func.func @transform_4(%arg0: i32) -> (i32, i32) {
    %c0_i32 = arith.constant 0 : i32
    %c0_i32_0 = arith.constant 0 : i32
    %c0_i32_1 = arith.constant 0 : i32
    return %c0_i32, %c0_i32_0 : i32, i32
  }
  func.func @transform_5(%arg0: i32) -> (i32, i32) {
    %c0_i32 = arith.constant 0 : i32
    %c0_i32_0 = arith.constant 0 : i32
    return %arg0, %c0_i32 : i32, i32
  }
}

</mosaic_0001>

<bundles_post_ra>
// kernel: multitask_wav2vec2_forward.1
= control target key start
LH: loop header
LB: loop body
LE: loop exit
PB: predicated region body
PF: predicated region fallthrough
CT: control target
= control target key end

     0   :  { %10 = vsyncpa [#allocation3], 0  ;;  %s2267_s18 = smov 0   ;;  %s2956_s0 = inlined_call_operand.vmem [shape: bf16[128,32], index: 0, kind: input, shape index: {}]   ;;  %s2957_s1 = inlined_call_operand.vmem [shape: bf16[32,768], index: 1, kind: input, shape index: {}]   ;;  %s2958_s2 = inlined_call_operand.vmem [shape: f32[1,768], index: 2, kind: input, shape index: {}]   ;;  %s2959_s3 = inlined_call_operand.hbm [shape: bf16[768,128], index: 3, kind: input, shape index: {}]   ;;  %s2960_s4 = inlined_call_operand.vmem [shape: f32[1,128], index: 4, kind: input, shape index: {}]   ;;  %s2961_s5 = inlined_call_operand.vmem [shape: bf16[128,128], index: 5, kind: output, shape index: {}]  }
   0x1 LB: > { %s1758_s19 = sadd.s32 4294967295, %s2231_s18   ;;  %p1760_p0 = scmp.ge.s32.totalorder %s2231_s18, 1  ;;  %s2231_s18 = sphi %s2267_s18, %s16_s18  }
   0x2   : > { %p157_p1 = scmp.lt.s32.totalorder %s2231_s18, 3  ;;  %s2233_s20 = smov [#allocation2]  }
   0x3   : > { %s175_s21 = sshll.u32 %s2233_s20, 4  ;;  %p2279_p3 = scmp.eq.s32.totalorder %s1758_s19, 0  ;;  %s176_s21 = int_to_ptr.vmem [resolvable:$true] %s175_s21 }
   0x4   : > { %p2275_p2 = pnand %p1760_p0, %p157_p1  ;;  %s2206_s24 = scalar_lea.vmem %s176_s21, 6144 }
   0x5   : > { %p2207_p7 = scmp.ne.s32.totalorder %s176_s21, %s2206_s24  ;;  %p2214_p10 = scmp.lt.s32.totalorder %s176_s21, %s176_s21 }
   0x6   : > { %p2011_p4 = pneg %p2275_p2  ;;  %p2215_p11 = scmp.lt.s32.totalorder %s2206_s24, %s2206_s24 }
   0x8   : > { %p2012_p5 = pnand %p2279_p3, %p2011_p4  ;;  %p2216_p12 = por %p2215_p11, %p2214_p10 }
   0xa   : > { %p2197_p6 = pneg %p2012_p5 }
   0xc   : > { %p2209_p8 = pnand %p2207_p7, %p2197_p6 }
   0xe   : > { %p2210_p9 = pneg %p2209_p8 }
  0x10   : > { %p2217_p13 = pnand %p2216_p12, %p2210_p9 }
  0x12   : > { %2220 = shalt.err (!%p2217_p13)
}
  0x13   : > { %s2234_s25 = smov 64   ;;  %s2235_s26 = smov 4  }
  0x14   : > { %2014 = dma.hbm_to_vmem [thread:$0]  (!%p2012_p5), %s2959_s3, 6144, %s176_s21, [#allocation3], %s2234_s25, %s2234_s25, %s2235_s26  }
  0x15   : > { %203 = sbr.rel (%p2275_p2) target bundleno = 586 (0x24a), region = 40 }
  0x1a   : > { %2226 = dma.done.wait (%p2279_p3), [#allocation3], 6144  }
  0x1b   : > { %2228 = vsyncadd (%p2279_p3), [#allocation3], 4294961152  ;;  %s1765_s29 = sshll.u32 %s1758_s19, 3  ;;  %v2236_v0 = vmov 0   ;;  %v2029_v1 = vld [vmem:[%s2957_s1 + $0x34] ss:$24 sps:$4 sm:$0xff]   ;;  %v266_v50 = vlaneseq }
  0x1c   : > { %421 = vmatprep.mubr.bf16.mxu0 %v2236_v0  ;;  %494 = vmatprep.mubr.bf16.mxu1 %v2236_v0  ;;  %p232_p0 = scmp.lt.s32.totalorder %s1765_s29, 15  ;;  %v2031_v2 = vld [vmem:[%s2957_s1 + $0x3c] ss:$24 sps:$4 sm:$0xff]   ;;  %v2033_v3 = vld [vmem:[%s2957_s1 + $0x30] ss:$24 sps:$4 sm:$0xff]   ;;  %vm376_vm0 = vcmask 261120  }
  0x1d   : > { %401 = vmatprep.subr.bf16.mxu0 %v2029_v1  ;;  %v2034_v4 = vld [vmem:[%s2957_s1 + $0x38] ss:$24 sps:$4 sm:$0xff]   ;;  %474 = vmatprep.subr.bf16.mxu1 %v2031_v2  ;;  %v2035_v5 = vld [vmem:[%s2957_s1 + $0x4] ss:$24 sps:$4 sm:$0xff]   ;;  %v2040_v8 = vld [vmem:[%s2957_s1 + $0x8] ss:$24 sps:$4 sm:$0xff]  }
  0x1e   : > { %s3016_s29 = smov (!%p232_p0, %s1765_s29), 15  ;;  %402 = vmatpush1.bf16.msra.mxu0 %v2033_v3  ;;  %475 = vmatpush1.bf16.msra.mxu1 %v2034_v4  ;;  %v2037_v6 = vld [vmem:[%s2957_s1 + $0xc] ss:$24 sps:$4 sm:$0xff]   ;;  %v2039_v7 = vld [vmem:[%s2957_s1] ss:$24 sps:$4 sm:$0xff]   ;;  %v2055_v21 = vld [vmem:[#allocation2 + $0x70] sm:$0xff]  }
  0x1f   : > { %s1766_s9 = sshll.u32 %s3016_s29, 2  ;;  %403 = vmatprep.subr.bf16.mxu0 %v2035_v5  ;;  %476 = vmatprep.subr.bf16.mxu1 %v2037_v6  ;;  %v2044_v10 = vld [vmem:[%s2957_s1 + $0x44] ss:$24 sps:$4 sm:$0xff]   ;;  %v2042_v11 = vld [vmem:[%s2957_s1 + $0x40] ss:$24 sps:$4 sm:$0xff]   ;;  %v2056_v22 = vld [vmem:[#allocation2 + $0xf0] sm:$0xff]  }
  0x20   : > { %s235_s23 = scalar_lea.vmem %s2956_s0, %s1766_s9  ;;  %v2049_v12 = vld [vmem:[%s2957_s1 + $0x14] ss:$24 sps:$4 sm:$0xff]   ;;  %v2047_v13 = vld [vmem:[%s2957_s1 + $0x10] ss:$24 sps:$4 sm:$0xff]   ;;  %v2051_v17 = vld [vmem:[#allocation2 + $0x78] sm:$0xff]   ;;  %v2352_v51 = vshrl.u32 %v266_v50, 7  ;;  %s2940_s17 = scalar_lea.vmem %s2961_s5, %s1766_s9 }
  0x21   : > { %v2041_v9 = vld [vmem:[%s235_s23] sm:$0xff]   ;;  %v2045_v14 = vld [vmem:[%s235_s23 + $0x8] sm:$0xff]   ;;  %v2046_v15 = vld [vmem:[%s235_s23 + $0x10] sm:$0xff]  }
  0x22   : > { %404 = vmatpush1.bf16.msra.mxu0 %v2039_v7  ;;  %477 = vmatpush1.bf16.msra.mxu1 %v2040_v8  ;;  %v2050_v16 = vld [vmem:[%s235_s23 + $0x18] sm:$0xff]   ;;  %v2057_v23 = vld [vmem:[#allocation2 + $0x30] sm:$0xff]   ;;  %v2059_v25 = vld [vmem:[#allocation2 + $0x68] sm:$0xff]   ;;  %v268_v52 = vsub.s32 0, %v2352_v51  ;;  %v276_v53 = vsub.s32 2, %v2352_v51  ;;  %v272_v55 = vsub.s32 1, %v2352_v51 }
  0x23   : > { %547 = vmatprep.subr.bf16.mxu0 %v2044_v10  ;;  %v2052_v18 = vld [vmem:[#allocation2 + $0xf8] sm:$0xff]   ;;  %1887 = vmatprep.subr.bf16.mxu1 %v2051_v17  ;;  %v2058_v24 = vld [vmem:[#allocation2 + $0xb0] sm:$0xff]   ;;  %v2060_v26 = vld [vmem:[#allocation2 + $0xe8] sm:$0xff]   ;;  %v280_v56 = vsub.s32 3, %v2352_v51 }
  0x24   : > { %v2053_v19 = vld [vmem:[#allocation2 + $0x38] sm:$0xff]   ;;  %v2061_v27 = vld [vmem:[#allocation2 + $0x28] sm:$0xff]   ;;  %v2063_v29 = vld [vmem:[#allocation2 + $0x60] sm:$0xff]  }
  0x25   : > { %1785 = vmatmul.mubr.msk.bf16.vlgmr.msra.gmra.mxu0 %vm376_vm0, %v2041_v9  ;;  %1789 = vmatmul.mubr.msk.bf16.vlgmr.msra.gmra.mxu1 %vm376_vm0, %v2041_v9  ;;  %v2054_v20 = vld [vmem:[#allocation2 + $0xb8] sm:$0xff]   ;;  %v2062_v28 = vld [vmem:[#allocation2 + $0xa8] sm:$0xff]   ;;  %v2064_v30 = vld [vmem:[#allocation2 + $0xe0] sm:$0xff]  }
  0x26   : > { %548 = vmatpush1.bf16.msra.mxu0 %v2042_v11  ;;  %431 = vmatprep.mubr.bf16.mxu0 %v2236_v0  ;;  %v2065_v31 = vld [vmem:[#allocation2 + $0x20] sm:$0xff]   ;;  %v2067_v33 = vld [vmem:[#allocation2 + $0x58] sm:$0xff]   ;;  %v2071_v37 = vld [vmem:[#allocation2 + $0x50] sm:$0xff]  }
  0x27   : > { %504 = vmatprep.mubr.bf16.mxu1 %v2236_v0  ;;  %549 = vmatprep.subr.bf16.mxu0 %v2049_v12  ;;  %v2066_v32 = vld [vmem:[#allocation2 + $0xa0] sm:$0xff]   ;;  %v2068_v34 = vld [vmem:[#allocation2 + $0xd8] sm:$0xff]   ;;  %v2072_v38 = vld [vmem:[#allocation2 + $0xd0] sm:$0xff]  }
  0x28   : > { %1888 = vmatpush3.bf16.msra.mxu1 %v2053_v19  ;;  %v2069_v35 = vld [vmem:[#allocation2 + $0x18] sm:$0xff]   ;;  %v2073_v39 = vld [vmem:[#allocation2 + $0x10] sm:$0xff]   ;;  %v2075_v41 = vld [vmem:[#allocation2 + $0x48] sm:$0xff]  }
  0x29   : > { %1889 = vmatprep.subr.bf16.mxu1 %v2055_v21  ;;  %v2070_v36 = vld [vmem:[#allocation2 + $0x98] sm:$0xff]   ;;  %v2074_v40 = vld [vmem:[#allocation2 + $0x90] sm:$0xff]   ;;  %v2076_v42 = vld [vmem:[#allocation2 + $0xc8] sm:$0xff]  }
  0x2a   : > { %550 = vmatpush1.bf16.msra.mxu0 %v2047_v13  ;;  %v2077_v43 = vld [vmem:[#allocation2 + $0x8] sm:$0xff]   ;;  %v2079_v45 = vld [vmem:[#allocation2 + $0x40] sm:$0xff]   ;;  %v2083_v49 = vld [vmem:[#allocation2 + $0x178] sm:$0xff]  }
  0x2b   : > { %1927 = vmatprep.subr.bf16.mxu0 %v2052_v18  ;;  %v2078_v44 = vld [vmem:[#allocation2 + $0x88] sm:$0xff]   ;;  %v2080_v46 = vld [vmem:[#allocation2 + $0xc0] sm:$0xff]  }
  0x2c   : > { %1890 = vmatpush3.bf16.msra.mxu1 %v2057_v23  ;;  %v2081_v47 = vld [vmem:[#allocation2] sm:$0xff]  }
  0x2d   : > { %1786 = vmatmul.mubr.msk.bf16.gmra.mxu0 %vm376_vm0, %v2045_v14  ;;  %1790 = vmatmul.mubr.msk.bf16.gmra.mxu1 %vm376_vm0, %v2045_v14  ;;  %v2082_v48 = vld [vmem:[#allocation2 + $0x80] sm:$0xff]  }
  0x2e   : > { %441 = vmatprep.mubr.bf16.mxu0 %v2236_v0  ;;  %514 = vmatprep.mubr.bf16.mxu1 %v2236_v0  ;;  %v2359_v54 = vld [vmem:[%s2958_s2] sm:$0x3f] }
  0x2f   : > { %1891 = vmatprep.subr.bf16.mxu1 %v2059_v25  ;;  %v2364_v57 = vrot.slane %v2359_v54, %v268_v52  ;;  %v2367_v58 = vrot.slane %v2359_v54, %v276_v53  ;;  %v2370_v59 = vrot.slane %v2359_v54, %v272_v55  ;;  %v2373_v60 = vrot.slane %v2359_v54, %v280_v56 }
  0x30   : > { %1892 = vmatpush3.bf16.msra.mxu1 %v2061_v27 }
  0x31   : > { %1893 = vmatprep.subr.bf16.mxu1 %v2063_v29 }
  0x34   : > { %1894 = vmatpush3.bf16.msra.mxu1 %v2065_v31 }
  0x35   : > { %1787 = vmatmul.mubr.msk.bf16.gmra.mxu0 %vm376_vm0, %v2046_v15  ;;  %1791 = vmatmul.mubr.msk.bf16.gmra.mxu1 %vm376_vm0, %v2046_v15 }
  0x36   : > { %451 = vmatprep.mubr.bf16.mxu0 %v2236_v0  ;;  %524 = vmatprep.mubr.bf16.mxu1 %v2236_v0 }
  0x37   : > { %1895 = vmatprep.subr.bf16.mxu1 %v2067_v33 }
  0x38   : > { %1896 = vmatpush3.bf16.msra.mxu1 %v2069_v35 }
  0x39   : > { %1897 = vmatprep.subr.bf16.mxu1 %v2071_v37 }
  0x3c   : > { %1898 = vmatpush3.bf16.msra.mxu1 %v2073_v39 }
  0x3d   : > { %1788 = vmatmul.mubr.msk.bf16.gmra.mxu0 %vm376_vm0, %v2050_v16  ;;  %1792 = vmatmul.mubr.msk.bf16.gmra.mxu1 %vm376_vm0, %v2050_v16 }
  0x3e   : > { %567 = vmatprep.mubr.bf16.mxu0 %v2236_v0  ;;  %1899 = vmatprep.subr.bf16.mxu1 %v2075_v41 }
  0x40   : > { %1900 = vmatpush3.bf16.msra.mxu1 %v2077_v43 }
  0x41   : > { %1901 = vmatprep.subr.bf16.mxu1 %v2079_v45 }
  0x44   : > { %1902 = vmatpush3.bf16.msra.mxu1 %v2081_v47 }
  0x45   : > { %1793 = vmatmul.mubr.msk.bf16.vlgmr.msra.gmra.mxu0 %vm376_vm0, %v2041_v9  ;;  %1967 = vmatprep.subr.bf16.mxu1 %v2083_v49 }
  0x46   : > { %577 = vmatprep.mubr.bf16.mxu0 %v2236_v0  ;;  %1928 = vmatpush3.bf16.msra.mxu0 %v2054_v20 }
  0x47   : > { %1929 = vmatprep.subr.bf16.mxu0 %v2056_v22 }
  0x4a   : > { %1930 = vmatpush3.bf16.msra.mxu0 %v2058_v24 }
  0x4b   : > { %1931 = vmatprep.subr.bf16.mxu0 %v2060_v26 }
  0x4d   : > { %1794 = vmatmul.mubr.msk.bf16.gmra.mxu0 %vm376_vm0, %v2045_v14 }
  0x4e   : > { %587 = vmatprep.mubr.bf16.mxu0 %v2236_v0  ;;  %1932 = vmatpush3.bf16.msra.mxu0 %v2062_v28 }
  0x4f   : > { %1933 = vmatprep.subr.bf16.mxu0 %v2064_v30 }
  0x52   : > { %1934 = vmatpush3.bf16.msra.mxu0 %v2066_v32 }
  0x53   : > { %1935 = vmatprep.subr.bf16.mxu0 %v2068_v34 }
  0x55   : > { %1795 = vmatmul.mubr.msk.bf16.gmra.mxu0 %vm376_vm0, %v2046_v15 }
  0x56   : > { %597 = vmatprep.mubr.bf16.mxu0 %v2236_v0  ;;  %1936 = vmatpush3.bf16.msra.mxu0 %v2070_v36 }
  0x57   : > { %1937 = vmatprep.subr.bf16.mxu0 %v2072_v38 }
  0x5a   : > { %1938 = vmatpush3.bf16.msra.mxu0 %v2074_v40 }
  0x5b   : > { %1939 = vmatprep.subr.bf16.mxu0 %v2076_v42 }
  0x5d   : > { %1796 = vmatmul.mubr.msk.bf16.gmra.mxu0 %vm376_vm0, %v2050_v16 }
  0x5e   : > { %1940 = vmatpush3.bf16.msra.mxu0 %v2078_v44 }
  0x5f   : > { %1941 = vmatprep.subr.bf16.mxu0 %v2080_v46 }
  0x62   : > { %1942 = vmatpush3.bf16.msra.mxu0 %v2082_v48 }
  0xe5   : > { %v423_v61 = vpop.f32.mrf.mxu0  ;;  %v496_v62 = vpop.f32.mrf.mxu1 }
  0xe6   : > { %v2376_v63 = vadd.f32 %v423_v61, %v2364_v57  ;;  %v2379_v0 = vadd.f32 %v496_v62, %v2367_v58 }
  0xe7   : > { %v425_v1 = vpop.f32.mrf.mxu0  ;;  %v498_v2 = vpop.f32.mrf.mxu1 }
  0xe8   : > { %v608_v3 = vmul.f32 %v2376_v63, %v2376_v63  ;;  %v610_v4 = vmul.f32 %v2379_v0, %v2379_v0  ;;  %v2386_v5 = vadd.f32 %v425_v1, %v2370_v59  ;;  %v2389_v6 = vadd.f32 %v498_v2, %v2373_v60 }
  0xe9   : > { %v427_v7 = vpop.f32.mrf.mxu0  ;;  %v500_v8 = vpop.f32.mrf.mxu1 }
  0xea   : > { %v656_v9 = vmul.f32 %v608_v3, %v2376_v63  ;;  %v658_v10 = vmul.f32 %v610_v4, %v2379_v0  ;;  %v609_v11 = vmul.f32 %v2386_v5, %v2386_v5  ;;  %v611_v12 = vmul.f32 %v2389_v6, %v2389_v6 }
  0xeb   : > { %v2398_v13 = vadd.f32 %v427_v7, %v2364_v57  ;;  %v2401_v14 = vadd.f32 %v500_v8, %v2367_v58  ;;  %v429_v15 = vpop.f32.mrf.mxu0  ;;  %v502_v16 = vpop.f32.mrf.mxu1 }
  0xec   : > { %v704_v17 = vmul.f32 0.044715, %v656_v9  ;;  %v706_v18 = vmul.f32 0.044715, %v658_v10  ;;  %v657_v19 = vmul.f32 %v609_v11, %v2386_v5  ;;  %v659_v20 = vmul.f32 %v611_v12, %v2389_v6 }
  0xed   : > { %v614_v21 = vmul.f32 %v2398_v13, %v2398_v13  ;;  %v616_v22 = vmul.f32 %v2401_v14, %v2401_v14  ;;  %v2410_v23 = vadd.f32 %v429_v15, %v2370_v59  ;;  %v2413_v24 = vadd.f32 %v502_v16, %v2373_v60  ;;  %v433_v25 = vpop.f32.mrf.mxu0  ;;  %v506_v26 = vpop.f32.mrf.mxu1 }
  0xee   : > { %v752_v27 = vadd.f32 %v704_v17, %v2376_v63  ;;  %v754_v28 = vadd.f32 %v706_v18, %v2379_v0  ;;  %v705_v29 = vmul.f32 0.044715, %v657_v19  ;;  %v707_v30 = vmul.f32 0.044715, %v659_v20 }
  0xef   : > { %v662_v31 = vmul.f32 %v614_v21, %v2398_v13  ;;  %v664_v32 = vmul.f32 %v616_v22, %v2401_v14  ;;  %v615_v33 = vmul.f32 %v2410_v23, %v2410_v23  ;;  %v617_v34 = vmul.f32 %v2413_v24, %v2413_v24  ;;  %v435_v35 = vpop.f32.mrf.mxu0  ;;  %v508_v44 = vpop.f32.mrf.mxu1 }
  0xf0   : > { %v800_v36 = vmul.f32 0.7978846, %v752_v27  ;;  %v802_v37 = vmul.f32 0.7978846, %v754_v28  ;;  %v753_v38 = vadd.f32 %v705_v29, %v2386_v5  ;;  %v755_v39 = vadd.f32 %v707_v30, %v2389_v6 }
  0xf1   : > { %v710_v40 = vmul.f32 0.044715, %v662_v31  ;;  %v712_v41 = vmul.f32 0.044715, %v664_v32  ;;  %v663_v42 = vmul.f32 %v615_v33, %v2410_v23  ;;  %v665_v43 = vmul.f32 %v617_v34, %v2413_v24  ;;  %v437_v45 = vpop.f32.mrf.mxu0  ;;  %v510_v3 = vpop.f32.mrf.mxu1 }
  0xf2   : > { %2099 = vtanh.f32 %v800_v36  ;;  %v801_v46 = vmul.f32 0.7978846, %v753_v38  ;;  %v803_v47 = vmul.f32 0.7978846, %v755_v39  ;;  %v2428_v48 = vadd.f32 %v433_v25, %v2364_v57 }
  0xf3   : > { %2101 = vtanh.f32 %v802_v37  ;;  %v758_v49 = vadd.f32 %v710_v40, %v2398_v13  ;;  %v760_v50 = vadd.f32 %v712_v41, %v2401_v14  ;;  %v711_v52 = vmul.f32 0.044715, %v663_v42  ;;  %v439_v53 = vpop.f32.mrf.mxu0  ;;  %v512_v25 = vpop.f32.mrf.mxu1 }
  0xf4   : > { %v713_v55 = vmul.f32 0.044715, %v665_v43  ;;  %v620_v56 = vmul.f32 %v2428_v48, %v2428_v48  ;;  %v2435_v61 = vadd.f32 %v506_v26, %v2367_v58  ;;  %2103 = vtanh.f32 %v801_v46 }
  0xf5   : > { %v806_v62 = vmul.f32 0.7978846, %v758_v49  ;;  %v808_v1 = vmul.f32 0.7978846, %v760_v50  ;;  %v759_v2 = vadd.f32 %v711_v52, %v2410_v23  ;;  %v443_v4 = vpop.f32.mrf.mxu0  ;;  %v2443_v10 = vadd.f32 %v435_v35, %v2370_v59  ;;  %v516_v43 = vpop.f32.mrf.mxu1 }
  0xf6   : > { %v761_v7 = vadd.f32 %v713_v55, %v2413_v24  ;;  %v668_v8 = vmul.f32 %v620_v56, %v2428_v48  ;;  %v622_v9 = vmul.f32 %v2435_v61, %v2435_v61  ;;  %2105 = vtanh.f32 %v803_v47 }
  0xf7   : > { %v2446_v11 = vadd.f32 %v508_v44, %v2373_v60  ;;  %v2449_v12 = vadd.f32 %v437_v45, %v2364_v57  ;;  %v2451_v15 = vpop.f32.mrf.mxu0  ;;  %v284_v16 = vsub.s32 4, %v2352_v51  ;;  %2107 = vtanh.f32 %v806_v62 }
  0xf8   : > { %v807_v17 = vmul.f32 0.7978846, %v759_v2  ;;  %v716_v18 = vmul.f32 0.044715, %v668_v8  ;;  %v670_v19 = vmul.f32 %v622_v9, %v2435_v61  ;;  %2109 = vtanh.f32 %v808_v1 }
  0xf9   : > { %v621_v20 = vmul.f32 %v2443_v10, %v2443_v10  ;;  %v623_v21 = vmul.f32 %v2446_v11, %v2446_v11  ;;  %v626_v22 = vmul.f32 %v2449_v12, %v2449_v12  ;;  %v2461_v26 = vpop.f32.mrf.mxu0  ;;  %v809_v27 = vmul.f32 0.7978846, %v761_v7 }
  0xfa   : > { %v764_v28 = vadd.f32 %v716_v18, %v2428_v48  ;;  %v718_v29 = vmul.f32 0.044715, %v670_v19  ;;  %v2465_v30 = vadd.f32 %v510_v3, %v2367_v58  ;;  %v2471_v34 = vadd.f32 %v439_v53, %v2370_v59 }
  0xfb   : > { %v669_v31 = vmul.f32 %v621_v20, %v2443_v10  ;;  %v671_v32 = vmul.f32 %v623_v21, %v2446_v11  ;;  %v674_v33 = vmul.f32 %v626_v22, %v2449_v12  ;;  %v2473_v35 = vpop.f32.mrf.mxu0  ;;  %2111 = vtanh.f32 %v807_v17  ;;  %v518_v17 = vpop.f32.mrf.mxu1 }
  0xfc   : > { %v766_v36 = vadd.f32 %v718_v29, %v2435_v61  ;;  %v628_v37 = vmul.f32 %v2465_v30, %v2465_v30  ;;  %v2479_v38 = vadd.f32 %v512_v25, %v2373_v60  ;;  %v627_v42 = vmul.f32 %v2471_v34, %v2471_v34 }
  0xfd   : > { %v717_v39 = vmul.f32 0.044715, %v669_v31  ;;  %v719_v40 = vmul.f32 0.044715, %v671_v32  ;;  %v722_v41 = vmul.f32 0.044715, %v674_v33  ;;  %2113 = vtanh.f32 %v809_v27  ;;  %v2486_v46 = vpop.f32.mrf.mxu0 }
  0xfe   : > { %v676_v44 = vmul.f32 %v628_v37, %v2465_v30  ;;  %v629_v45 = vmul.f32 %v2479_v38, %v2479_v38  ;;  %v288_v47 = vsub.s32 5, %v2352_v51  ;;  %v812_v50 = vmul.f32 0.7978846, %v764_v28 }
  0xff   : > { %v2100_v49 = vpop.eup %2099  ;;  %v765_v52 = vadd.f32 %v717_v39, %v2443_v10  ;;  %v767_v53 = vadd.f32 %v719_v40, %v2446_v11  ;;  %v675_v55 = vmul.f32 %v627_v42, %v2471_v34  ;;  %v814_v1 = vmul.f32 0.7978846, %v766_v36  ;;  %v2500_v25 = vpop.f32.mrf.mxu0 }
 0x100   : > { %v2102_v56 = vpop.eup %2101  ;;  %v896_v62 = vadd.f32 1.0, %v2100_v49  ;;  %v724_v2 = vmul.f32 0.044715, %v676_v44  ;;  %v677_v3 = vmul.f32 %v629_v45, %v2479_v38  ;;  %v770_v9 = vadd.f32 %v722_v41, %v2449_v12  ;;  %v520_v39 = vpop.f32.mrf.mxu1 }
 0x101   : > { %v898_v7 = vadd.f32 1.0, %v2102_v56  ;;  %v813_v8 = vmul.f32 0.7978846, %v765_v52  ;;  %v2495_v51 = vadd.f32 %v443_v4, %v2364_v57  ;;  %v2497_v18 = vpop.eup %2103  ;;  %v815_v20 = vmul.f32 0.7978846, %v767_v53  ;;  %v2518_v49 = vpop.f32.mrf.mxu0 }
 0x102   : > { %v944_v19 = vmul.f32 0.5, %v896_v62  ;;  %v772_v21 = vadd.f32 %v724_v2, %v2465_v30  ;;  %v723_v22 = vmul.f32 0.044715, %v675_v55  ;;  %2115 = vtanh.f32 %v812_v50 }
 0x103   : > { %2980 = vst [vmem:[#allocation5_spill] sm:$0xff] %v2495_v51  ;;  %v946_v27 = vmul.f32 0.5, %v898_v7  ;;  %v725_v28 = vmul.f32 0.044715, %v677_v3  ;;  %v632_v29 = vmul.f32 %v2495_v51, %v2495_v51  ;;  %v2504_v31 = vpop.eup %2105  ;;  %2117 = vtanh.f32 %v814_v1  ;;  %v522_v1 = vpop.f32.mrf.mxu1 }
 0x104   : > { %v771_v4 = vadd.f32 %v723_v22, %v2471_v34  ;;  %v2508_v32 = vrot.slane %v2359_v54, %v284_v16  ;;  %v2108_v33 = vpop.eup %2107  ;;  %2119 = vtanh.f32 %v813_v8  ;;  %v818_v36 = vmul.f32 0.7978846, %v770_v9  ;;  %v2546_v7 = vpop.f32.mrf.mxu0 }
 0x105   : > { %v773_v37 = vadd.f32 %v725_v28, %v2479_v38  ;;  %v2512_v40 = vrot.slane %v2359_v54, %v288_v47  ;;  %v2110_v41 = vpop.eup %2109  ;;  %v2515_v42 = vmul.f32 %v944_v19, %v2376_v63  ;;  %2121 = vtanh.f32 %v815_v20 }
 0x106   : > { %v820_v44 = vmul.f32 0.7978846, %v772_v21  ;;  %v680_v45 = vmul.f32 %v632_v29, %v2495_v51  ;;  %v2521_v16 = vmul.f32 %v946_v27, %v2379_v0  ;;  %v819_v50 = vmul.f32 0.7978846, %v771_v4  ;;  %v526_v4 = vpop.f32.mrf.mxu1 }
 0x107   : > { %v2524_v52 = vadd.f32 %v516_v43, %v2367_v58  ;;  %v2528_v54 = vadd.f32 %v2451_v15, %v2370_v59  ;;  %v902_v47 = vadd.f32 1.0, %v2108_v33  ;;  %v821_v63 = vmul.f32 0.7978846, %v773_v37 }
 0x108   : > { %v728_v53 = vmul.f32 0.044715, %v680_v45  ;;  %v2531_v55 = vadd.f32 %v518_v17, %v2373_v60  ;;  %v2533_v56 = vpop.eup %2111  ;;  %v904_v62 = vadd.f32 1.0, %v2110_v41  ;;  %2123 = vtanh.f32 %v818_v36  ;;  %v2568_v41 = vpop.f32.mrf.mxu0 }
 0x109   : > { %2981 = vst [vmem:[#allocation6_spill] sm:$0xff] %v2524_v52  ;;  %v634_v0 = vmul.f32 %v2524_v52, %v2524_v52  ;;  %v633_v43 = vmul.f32 %v2528_v54, %v2528_v54  ;;  %2125 = vtanh.f32 %v820_v44  ;;  %v2544_v3 = vadd.f32 %v2461_v26, %v2364_v57 }
 0x10a   : > { %2982 = vst [vmem:[#allocation7_spill] sm:$0xff] %v2531_v55  ;;  %v776_v15 = vadd.f32 %v728_v53, %v2495_v51  ;;  %v635_v2 = vmul.f32 %v2531_v55, %v2531_v55  ;;  %v2548_v8 = vpop.eup %2113  ;;  %2127 = vtanh.f32 %v819_v50  ;;  %v2553_v19 = vadd.f32 %v520_v39, %v2367_v58 }
 0x10b   : > { %2983 = vst [vmem:[#allocation8_spill] sm:$0xff] %v2544_v3  ;;  %v682_v9 = vmul.f32 %v634_v0, %v2524_v52  ;;  %v681_v17 = vmul.f32 %v633_v43, %v2528_v54  ;;  %v950_v20 = vmul.f32 0.5, %v902_v47  ;;  %2129 = vtanh.f32 %v821_v63 }
 0x10c   : > { %2984 = vst [vmem:[#allocation9_spill] sm:$0xff] %v2553_v19  ;;  %v683_v21 = vmul.f32 %v635_v2, %v2531_v55  ;;  %v638_v26 = vmul.f32 %v2544_v3, %v2544_v3  ;;  %v640_v28 = vmul.f32 %v2553_v19, %v2553_v19  ;;  %v2562_v29 = vadd.f32 %v2473_v35, %v2370_v59 }
 0x10d   : > { %v730_v22 = vmul.f32 0.044715, %v682_v9  ;;  %v729_v27 = vmul.f32 0.044715, %v681_v17  ;;  %v824_v33 = vmul.f32 0.7978846, %v776_v15  ;;  %v2566_v39 = vadd.f32 %v522_v1, %v2373_v60 }
 0x10e   : > { %v731_v36 = vmul.f32 0.044715, %v683_v21  ;;  %v686_v37 = vmul.f32 %v638_v26, %v2544_v3  ;;  %v688_v50 = vmul.f32 %v640_v28, %v2553_v19  ;;  %v639_v35 = vmul.f32 %v2562_v29, %v2562_v29  ;;  %v528_v21 = vpop.f32.mrf.mxu1 }
 0x10f   : > { %2985 = vst [vmem:[#allocation10_spill] sm:$0xff] %v2566_v39  ;;  %v778_v44 = vadd.f32 %v730_v22, %v2524_v52  ;;  %v777_v45 = vadd.f32 %v729_v27, %v2528_v54  ;;  %v2575_v47 = vpop.eup %2115  ;;  %v641_v0 = vmul.f32 %v2566_v39, %v2566_v39  ;;  %v2582_v43 = vadd.f32 %v2486_v46, %v2364_v57  ;;  %v2593_v46 = vpop.f32.mrf.mxu0 }
 0x110   : > { %v779_v63 = vadd.f32 %v731_v36, %v2531_v55  ;;  %v734_v53 = vmul.f32 0.044715, %v686_v37  ;;  %v2584_v1 = vpop.eup %2117  ;;  %v736_v9 = vmul.f32 0.044715, %v688_v50  ;;  %v687_v17 = vmul.f32 %v639_v35, %v2562_v29 }
 0x111   : > { %2986 = vst [vmem:[#allocation11_spill] sm:$0xff] %v2582_v43  ;;  %v826_v15 = vmul.f32 0.7978846, %v778_v44  ;;  %v825_v2 = vmul.f32 0.7978846, %v777_v45  ;;  %v2587_v26 = vpop.eup %2119  ;;  %2131 = vtanh.f32 %v824_v33  ;;  %v689_v27 = vmul.f32 %v641_v0, %v2566_v39 }
 0x112   : > { %v782_v22 = vadd.f32 %v734_v53, %v2544_v3  ;;  %v644_v28 = vmul.f32 %v2582_v43, %v2582_v43  ;;  %v2595_v36 = vpop.eup %2121  ;;  %v827_v37 = vmul.f32 0.7978846, %v779_v63  ;;  %v784_v44 = vadd.f32 %v736_v9, %v2553_v19  ;;  %v530_v63 = vpop.f32.mrf.mxu1 }
 0x113   : > { %v735_v45 = vmul.f32 0.044715, %v687_v17  ;;  %v2599_v50 = vadd.f32 %v526_v4, %v2367_v58  ;;  %2133 = vtanh.f32 %v826_v15  ;;  %v737_v35 = vmul.f32 0.044715, %v689_v27 }
 0x114   : > { %v830_v33 = vmul.f32 0.7978846, %v782_v22  ;;  %v692_v53 = vmul.f32 %v644_v28, %v2582_v43  ;;  %v2602_v0 = vmul.f32 0.5, %v904_v62  ;;  %2135 = vtanh.f32 %v825_v2  ;;  %v2614_v22 = vpop.f32.mrf.mxu0 }
 0x115   : > { %2987 = vst [vmem:[#allocation12_spill] sm:$0xff] %v2599_v50  ;;  %v783_v52 = vadd.f32 %v735_v45, %v2562_v29  ;;  %v646_v3 = vmul.f32 %v2599_v50, %v2599_v50  ;;  %v2607_v51 = vpop.eup %2123  ;;  %v832_v9 = vmul.f32 0.7978846, %v784_v44  ;;  %v785_v4 = vadd.f32 %v737_v35, %v2566_v39 }
 0x116   : > { %v740_v17 = vmul.f32 0.044715, %v692_v53  ;;  %v2612_v15 = vadd.f32 %v2500_v25, %v2370_v59  ;;  %v2616_v62 = vpop.eup %2125  ;;  %v2619_v2 = vmul.f32 %v950_v20, %v2398_v13  ;;  %2137 = vtanh.f32 %v827_v37  ;;  %v532_v37 = vpop.f32.mrf.mxu1 }
 0x117   : > { %v694_v27 = vmul.f32 %v646_v3, %v2599_v50  ;;  %v2623_v28 = vadd.f32 %v528_v21, %v2373_v60  ;;  %v2625_v44 = vpop.eup %2127  ;;  %2139 = vtanh.f32 %v830_v33  ;;  %v831_v45 = vmul.f32 0.7978846, %v783_v52 }
 0x118   : > { %2988 = vst [vmem:[#allocation13_spill] sm:$0xff] %v2612_v15  ;;  %v645_v25 = vmul.f32 %v2612_v15, %v2612_v15  ;;  %v2631_v35 = vadd.f32 %v2518_v49, %v2364_v57  ;;  %v2633_v53 = vpop.eup %2129  ;;  %v788_v13 = vadd.f32 %v740_v17, %v2582_v43  ;;  %v2639_v21 = vadd.f32 %v530_v63, %v2367_v58  ;;  %v575_v49 = vpop.f32.mrf.mxu0 }
 0x119   : > { %2989 = vst [vmem:[#allocation14_spill] sm:$0xff] %v2623_v28  ;;  %v742_v20 = vmul.f32 0.044715, %v694_v27  ;;  %v647_v3 = vmul.f32 %v2623_v28, %v2623_v28  ;;  %2141 = vtanh.f32 %v832_v9  ;;  %v833_v52 = vmul.f32 0.7978846, %v785_v4 }
 0x11a   : > { %2990 = vst [vmem:[#allocation15_spill] sm:$0xff] %v2631_v35  ;;  %2991 = vst [vmem:[#allocation16_spill] sm:$0xff] %v2639_v21  ;;  %v693_v33 = vmul.f32 %v645_v25, %v2612_v15  ;;  %v650_v57 = vmul.f32 %v2631_v35, %v2631_v35  ;;  %v652_v27 = vmul.f32 %v2639_v21, %v2639_v21  ;;  %2143 = vtanh.f32 %v831_v45  ;;  %v579_v45 = vpop.f32.mrf.mxu0 }
 0x11b   : > { %v790_v19 = vadd.f32 %v742_v20, %v2599_v50  ;;  %v695_v17 = vmul.f32 %v647_v3, %v2623_v28  ;;  %v2650_v58 = vadd.f32 %v2546_v7, %v2370_v59  ;;  %v2654_v4 = vadd.f32 %v532_v37, %v2373_v60 }
 0x11c   : > { %v741_v63 = vmul.f32 0.044715, %v693_v33  ;;  %v698_v9 = vmul.f32 %v650_v57, %v2631_v35  ;;  %v836_v25 = vmul.f32 0.7978846, %v788_v13  ;;  %v700_v20 = vmul.f32 %v652_v27, %v2639_v21 }
 0x11d   : > { %2992 = vst [vmem:[#allocation17_spill] sm:$0xff] %v2650_v58  ;;  %2993 = vst [vmem:[#allocation18_spill] sm:$0xff] %v2654_v4  ;;  %v743_v43 = vmul.f32 0.044715, %v695_v17  ;;  %v651_v3 = vmul.f32 %v2650_v58, %v2650_v58  ;;  %v653_v59 = vmul.f32 %v2654_v4, %v2654_v4  ;;  %v2664_v7 = vadd.f32 %v2568_v41, %v2508_v32 }
 0x11e   : > { %v789_v50 = vadd.f32 %v741_v63, %v2612_v15  ;;  %v746_v39 = vmul.f32 0.044715, %v698_v9  ;;  %v2666_v60 = vpop.eup %2131  ;;  %v838_v13 = vmul.f32 0.7978846, %v790_v19  ;;  %v748_v33 = vmul.f32 0.044715, %v700_v20 }
 0x11f   : > { %2994 = vst [vmem:[#allocation19_spill] sm:$0xff] %v2664_v7  ;;  %v791_v37 = vadd.f32 %v743_v43, %v2623_v28  ;;  %v699_v57 = vmul.f32 %v651_v3, %v2650_v58  ;;  %v701_v63 = vmul.f32 %v653_v59, %v2654_v4  ;;  %v612_v9 = vmul.f32 %v2664_v7, %v2664_v7  ;;  %v581_v3 = vpop.f32.mrf.mxu0 }
 0x120   : > { %v837_v17 = vmul.f32 0.7978846, %v789_v50  ;;  %v794_v27 = vadd.f32 %v746_v39, %v2631_v35  ;;  %v2674_v15 = vpop.eup %2133  ;;  %2145 = vtanh.f32 %v833_v52  ;;  %v796_v55 = vadd.f32 %v748_v33, %v2639_v21 }
 0x121   : > { %v839_v41 = vmul.f32 0.7978846, %v791_v37  ;;  %v2679_v19 = vadd.f32 %v2593_v46, %v2512_v40  ;;  %v2681_v43 = vpop.eup %2135  ;;  %v2685_v39 = vmul.f32 %v2602_v0, %v2401_v14  ;;  %2147 = vtanh.f32 %v836_v25 }
 0x122   : > { %v747_v50 = vmul.f32 0.044715, %v699_v57  ;;  %v660_v20 = vmul.f32 %v612_v9, %v2664_v7  ;;  %2149 = vtanh.f32 %v838_v13  ;;  %v842_v59 = vmul.f32 0.7978846, %v794_v27 }
 0x123   : > { %v613_v46 = vmul.f32 %v2679_v19, %v2679_v19  ;;  %v2692_v37 = vpop.eup %2137  ;;  %2151 = vtanh.f32 %v837_v17  ;;  %v749_v33 = vmul.f32 0.044715, %v701_v63  ;;  %v2696_v14 = vadd.f32 %v2614_v22, %v2508_v32  ;;  %v583_v22 = vpop.f32.mrf.mxu0 }
 0x124   : > { %v708_v21 = vmul.f32 0.044715, %v660_v20  ;;  %v2698_v0 = vpop.eup %2139  ;;  %2153 = vtanh.f32 %v839_v41  ;;  %v844_v25 = vmul.f32 0.7978846, %v796_v55  ;;  %v2702_v13 = vadd.f32 %v575_v49, %v2512_v40 }
 0x125   : > { %v661_v57 = vmul.f32 %v613_v46, %v2679_v19  ;;  %v795_v27 = vadd.f32 %v747_v50, %v2650_v58  ;;  %v618_v17 = vmul.f32 %v2696_v14, %v2696_v14  ;;  %v2709_v63 = vadd.f32 %v579_v45, %v2508_v32 }
 0x126   : > { %v756_v9 = vadd.f32 %v708_v21, %v2664_v7  ;;  %v2711_v20 = vpop.eup %2141  ;;  %2155 = vtanh.f32 %v842_v59  ;;  %v619_v41 = vmul.f32 %v2702_v13, %v2702_v13  ;;  %v897_v49 = vadd.f32 1.0, %v2497_v18 }
 0x127   : > { %2995 = vst [vmem:[#allocation20_spill] sm:$0xff] %v2709_v63  ;;  %2996 = vst [vmem:[#allocation21_spill] sm:$0xff] %v2711_v20  ;;  %v709_v55 = vmul.f32 0.044715, %v661_v57  ;;  %v797_v50 = vadd.f32 %v749_v33, %v2654_v4  ;;  %v666_v21 = vmul.f32 %v618_v17, %v2696_v14  ;;  %v624_v52 = vmul.f32 %v2709_v63, %v2709_v63  ;;  %v2720_v45 = vpop.eup %2143 }
 0x128   : > { %v804_v46 = vmul.f32 0.7978846, %v756_v9  ;;  %2157 = vtanh.f32 %v844_v25  ;;  %v667_v7 = vmul.f32 %v619_v41, %v2702_v13  ;;  %v903_v59 = vadd.f32 1.0, %v2533_v56  ;;  %v585_v9 = vpop.f32.mrf.mxu0 }
 0x129   : > { %v945_v57 = vmul.f32 0.5, %v897_v49  ;;  %v843_v35 = vmul.f32 0.7978846, %v795_v27  ;;  %v714_v28 = vmul.f32 0.044715, %v666_v21  ;;  %v672_v18 = vmul.f32 %v624_v52, %v2709_v63 }
 0x12a   : > { %v899_v33 = vadd.f32 1.0, %v2504_v31  ;;  %v1042_v17 = vpack.c.bf16 %v2685_v39, %v2521_v16  ;;  %2159 = vtanh.f32 %v804_v46  ;;  %v757_v4 = vadd.f32 %v709_v55, %v2679_v19  ;;  %v589_v46 = vpop.f32.mrf.mxu0 }
 0x12b   : > { %v951_v58 = vmul.f32 0.5, %v903_v59  ;;  %v762_v25 = vadd.f32 %v714_v28, %v2696_v14  ;;  %v715_v41 = vmul.f32 0.044715, %v667_v7  ;;  %v905_v56 = vadd.f32 1.0, %v2548_v8 }
 0x12c   : > { %v947_v49 = vmul.f32 0.5, %v899_v33  ;;  %v720_v27 = vmul.f32 0.044715, %v672_v18  ;;  %v993_v21 = vmul.f32 %v945_v57, %v2386_v5  ;;  %v2734_v31 = vadd.f32 %v581_v3, %v2512_v40  ;;  %v2084_v5 = vld [vmem:[#allocation2 + $0x138] sm:$0xff]  }
 0x12d   : > { %v999_v52 = vmul.f32 %v951_v58, %v2410_v23  ;;  %v2736_v20 = vpop.eup %2145  ;;  %2161 = vtanh.f32 %v843_v35  ;;  %v845_v16 = vmul.f32 0.7978846, %v797_v50  ;;  %v810_v39 = vmul.f32 0.7978846, %v762_v25 }
 0x12e   : > { %v953_v55 = vmul.f32 0.5, %v905_v56  ;;  %v2738_v28 = vpop.eup %2147  ;;  %v805_v7 = vmul.f32 0.7978846, %v757_v4  ;;  %v625_v59 = vmul.f32 %v2734_v31, %v2734_v31  ;;  %v2743_v23 = vadd.f32 %v583_v22, %v2508_v32  ;;  %v2085_v4 = vld [vmem:[#allocation2 + $0x170] sm:$0xff]  }
 0x12f   : > { %v1041_v8 = vpack.c.bf16 %v999_v52, %v993_v21  ;;  %v2745_v58 = vpop.eup %2149  ;;  %v763_v3 = vadd.f32 %v715_v41, %v2702_v13  ;;  %v995_v35 = vmul.f32 %v947_v49, %v2389_v6  ;;  %v2751_v57 = vadd.f32 %v585_v9, %v2512_v40 }
 0x130   : > { %v1001_v50 = vmul.f32 %v953_v55, %v2413_v24  ;;  %v2753_v18 = vpop.eup %2151  ;;  %v768_v33 = vadd.f32 %v720_v27, %v2709_v63  ;;  %v673_v22 = vmul.f32 %v625_v59, %v2734_v31  ;;  %v630_v25 = vmul.f32 %v2743_v23, %v2743_v23  ;;  %v591_v27 = vpop.f32.mrf.mxu0  ;;  %v2086_v55 = vld [vmem:[#allocation2 + $0x130] sm:$0xff]  }
 0x131   : > { %1487 = vmatprep.mubr.bf16.mxu1 %v1041_v8  ;;  %v2760_v41 = vadd.f32 %v589_v46, %v2508_v32  ;;  %v2762_v6 = vpop.eup %2153  ;;  %2163 = vtanh.f32 %v810_v39  ;;  %v2997_v9 = vpack.c.bf16 %v2619_v2, %v2515_v42  ;;  %v631_v56 = vmul.f32 %v2751_v57, %v2751_v57 }
 0x132   : > { %v1043_v24 = vpack.c.bf16 %v1001_v50, %v995_v35  ;;  %v909_v49 = vadd.f32 1.0, %v2587_v26  ;;  %v721_v21 = vmul.f32 0.044715, %v673_v22  ;;  %v678_v52 = vmul.f32 %v630_v25, %v2743_v23 }
 0x133   : > { %1488 = vmatmul.mubr.bf16.vlgmr.msra.gmra.mxu1 %v2997_v9  ;;  %v636_v46 = vmul.f32 %v2760_v41, %v2760_v41  ;;  %v915_v39 = vadd.f32 1.0, %v2625_v44  ;;  %v2774_v8 = vpop.eup %2155  ;;  %v679_v42 = vmul.f32 %v631_v56, %v2751_v57  ;;  %v911_v26 = vadd.f32 1.0, %v2595_v36 }
 0x134   : > { %1968 = vmatpush3.bf16.msra.mxu1 %v2084_v5  ;;  %1552 = vmatprep.mubr.bf16.mxu0 %v1043_v24  ;;  %v957_v2 = vmul.f32 0.5, %v909_v49  ;;  %v917_v59 = vadd.f32 1.0, %v2633_v53  ;;  %v2087_v5 = vld [vmem:[#allocation2 + $0x168] sm:$0xff]   ;;  %v769_v35 = vadd.f32 %v721_v21, %v2734_v31  ;;  %v726_v50 = vmul.f32 0.044715, %v678_v52 }
 0x135   : > { %1969 = vmatprep.subr.bf16.mxu1 %v2085_v4  ;;  %1553 = vmatmul.mubr.bf16.vlgmr.msra.gmra.mxu0 %v1042_v17  ;;  %v684_v22 = vmul.f32 %v636_v46, %v2760_v41  ;;  %v963_v25 = vmul.f32 0.5, %v915_v39  ;;  %v2781_v44 = vpop.eup %2157  ;;  %v811_v9 = vmul.f32 0.7978846, %v763_v3  ;;  %v727_v24 = vmul.f32 0.044715, %v679_v42  ;;  %v593_v4 = vpop.f32.mrf.mxu0  ;;  %v2088_v21 = vld [vmem:[#allocation2 + $0x128] sm:$0xff]  }
 0x136   : > { %v959_v63 = vmul.f32 0.5, %v911_v26  ;;  %v965_v56 = vmul.f32 0.5, %v917_v59  ;;  %2165 = vtanh.f32 %v845_v16  ;;  %v816_v49 = vmul.f32 0.7978846, %v768_v33  ;;  %v2089_v42 = vld [vmem:[#allocation2 + $0x160] sm:$0xff]  }
 0x137   : > { %v1005_v36 = vmul.f32 %v957_v2, %v2443_v10  ;;  %v1011_v53 = vmul.f32 %v963_v25, %v2471_v34  ;;  %v2160_v17 = vpop.eup %2159  ;;  %v817_v52 = vmul.f32 0.7978846, %v769_v35  ;;  %v774_v46 = vadd.f32 %v726_v50, %v2743_v23  ;;  %v2091_v35 = vld [vmem:[#allocation2 + $0x158] sm:$0xff]  }
 0x138   : > { %1970 = vmatpush3.bf16.msra.mxu1 %v2086_v55  ;;  %v1007_v39 = vmul.f32 %v959_v63, %v2446_v11  ;;  %v1013_v3 = vmul.f32 %v965_v56, %v2479_v38  ;;  %2167 = vtanh.f32 %v805_v7  ;;  %v732_v26 = vmul.f32 0.044715, %v684_v22  ;;  %v595_v55 = vpop.f32.mrf.mxu0  ;;  %v2090_v63 = vld [vmem:[#allocation2 + $0x120] sm:$0xff]  }
 0x139   : > { %1971 = vmatprep.subr.bf16.mxu1 %v2087_v5  ;;  %v1047_v16 = vpack.c.bf16 %v1011_v53, %v1005_v36  ;;  %2169 = vtanh.f32 %v811_v9  ;;  %v775_v33 = vadd.f32 %v727_v24, %v2751_v57  ;;  %v2790_v34 = vadd.f32 %v591_v27, %v2512_v40 }
 0x13a   : > { %v1049_v10 = vpack.c.bf16 %v1013_v3, %v1007_v39  ;;  %v2792_v2 = vpop.eup %2161  ;;  %v2794_v59 = vadd.f32 1.0, %v2160_v17  ;;  %2171 = vtanh.f32 %v816_v49  ;;  %v908_v11 = vadd.f32 1.0, %v2575_v47  ;;  %v599_v49 = vpop.f32.mrf.mxu0 }
 0x13b   : > { %1495 = vmatprep.mubr.bf16.mxu1 %v1047_v16  ;;  %v914_v38 = vadd.f32 1.0, %v2607_v51  ;;  %2173 = vtanh.f32 %v817_v52  ;;  %v822_v7 = vmul.f32 0.7978846, %v774_v46  ;;  %v637_v27 = vmul.f32 %v2790_v34, %v2790_v34 }
 0x13c   : > { %1972 = vmatpush3.bf16.msra.mxu1 %v2088_v21  ;;  %1560 = vmatprep.mubr.bf16.mxu0 %v1049_v10  ;;  %v910_v5 = vadd.f32 1.0, %v2584_v1  ;;  %v780_v50 = vadd.f32 %v732_v26, %v2760_v41  ;;  %v956_v22 = vmul.f32 0.5, %v908_v11  ;;  %v916_v47 = vadd.f32 1.0, %v2616_v62 }
 0x13d   : > { %1973 = vmatprep.subr.bf16.mxu1 %v2089_v42  ;;  %v962_v25 = vmul.f32 0.5, %v914_v38  ;;  %v823_v9 = vmul.f32 0.7978846, %v775_v33  ;;  %v685_v51 = vmul.f32 %v637_v27, %v2790_v34  ;;  %v2805_v56 = vadd.f32 %v593_v4, %v2508_v32  ;;  %v2092_v4 = vld [vmem:[#allocation2 + $0x118] sm:$0xff]   ;;  %v2093_v42 = vld [vmem:[#allocation2 + $0x150] sm:$0xff]   ;;  %v601_v38 = vpop.f32.mrf.mxu0 }
 0x13e   : > { %v958_v24 = vmul.f32 0.5, %v910_v5  ;;  %v2164_v36 = vpop.eup %2163  ;;  %v1004_v53 = vmul.f32 %v956_v22, %v2428_v48  ;;  %v964_v21 = vmul.f32 0.5, %v916_v47  ;;  %v2810_v17 = vadd.f32 %v595_v55, %v2512_v40 }
 0x13f   : > { %v1010_v1 = vmul.f32 %v962_v25, %v2449_v12  ;;  %2175 = vtanh.f32 %v822_v7  ;;  %v733_v62 = vmul.f32 0.044715, %v685_v51  ;;  %v642_v46 = vmul.f32 %v2805_v56, %v2805_v56  ;;  %v2095_v51 = vld [vmem:[#allocation2 + $0x148] sm:$0xff]  }
 0x140   : > { %1974 = vmatpush3.bf16.msra.mxu1 %v2090_v63  ;;  %v1006_v52 = vmul.f32 %v958_v24, %v2435_v61  ;;  %v1012_v3 = vmul.f32 %v964_v21, %v2465_v30  ;;  %v643_v48 = vmul.f32 %v2810_v17, %v2810_v17  ;;  %v2819_v12 = vadd.f32 %v599_v49, %v2508_v32  ;;  %v2094_v63 = vld [vmem:[#allocation2 + $0x110] sm:$0xff]  }
 0x141   : > { %1975 = vmatprep.subr.bf16.mxu1 %v2091_v35  ;;  %v1046_v39 = vpack.c.bf16 %v1010_v1, %v1004_v53  ;;  %v828_v26 = vmul.f32 0.7978846, %v780_v50  ;;  %v781_v16 = vadd.f32 %v733_v62, %v2790_v34  ;;  %v690_v61 = vmul.f32 %v642_v46, %v2805_v56 }
 0x142   : > { %v921_v33 = vadd.f32 1.0, %v2681_v43  ;;  %v1048_v10 = vpack.c.bf16 %v1012_v3, %v1006_v52  ;;  %v691_v55 = vmul.f32 %v643_v48, %v2810_v17  ;;  %v648_v30 = vmul.f32 %v2819_v12, %v2819_v12 }
 0x143   : > { %1496 = vmatmul.mubr.bf16.gmra.mxu1 %v1046_v39  ;;  %v927_v11 = vadd.f32 1.0, %v2720_v45  ;;  %v2828_v7 = vpop.eup %2165  ;;  %v906_v27 = vadd.f32 1.0, %v2164_v36  ;;  %v829_v5 = vmul.f32 0.7978846, %v781_v16  ;;  %v738_v35 = vmul.f32 0.044715, %v690_v61 }
 0x144   : > { %v969_v50 = vmul.f32 0.5, %v921_v33  ;;  %1976 = vmatpush3.bf16.msra.mxu1 %v2092_v4  ;;  %1561 = vmatmul.mubr.bf16.gmra.mxu0 %v1048_v10  ;;  %v739_v43 = vmul.f32 0.044715, %v691_v55  ;;  %v696_v22 = vmul.f32 %v648_v30, %v2819_v12  ;;  %v923_v47 = vadd.f32 1.0, %v2692_v37  ;;  %v603_v37 = vpop.f32.mrf.mxu0  ;;  %v2998_v16 = vld [vmem:[#allocation7_spill] sm:$0xff] }
 0x145   : > { %v975_v25 = vmul.f32 0.5, %v927_v11  ;;  %1977 = vmatprep.subr.bf16.mxu1 %v2093_v42  ;;  %v2832_v24 = vpop.eup %2167  ;;  %2177 = vtanh.f32 %v823_v9  ;;  %v786_v45 = vadd.f32 %v738_v35, %v2805_v56  ;;  %v929_v36 = vadd.f32 1.0, %v2736_v20  ;;  %v2096_v20 = vld [vmem:[#allocation2 + $0x108] sm:$0xff]   ;;  %v2097_v42 = vld [vmem:[#allocation2 + $0x140] sm:$0xff]  }
 0x146   : > { %v1017_v49 = vmul.f32 %v969_v50, %v2528_v54  ;;  %v2837_v53 = vpop.eup %2169  ;;  %v787_v1 = vadd.f32 %v739_v43, %v2810_v17  ;;  %v744_v21 = vmul.f32 0.044715, %v696_v22  ;;  %v971_v52 = vmul.f32 0.5, %v923_v47  ;;  %v3000_v50 = vld [vmem:[#allocation21_spill] sm:$0xff] }
 0x147   : > { %v1023_v62 = vmul.f32 %v975_v25, %v2562_v29  ;;  %v2841_v46 = vpop.eup %2171  ;;  %2179 = vtanh.f32 %v828_v26  ;;  %v977_v4 = vmul.f32 0.5, %v929_v36  ;;  %v2844_v9 = vadd.f32 %v601_v38, %v2512_v40  ;;  %v2999_v26 = vld [vmem:[#allocation10_spill] sm:$0xff]  ;;  %v2098_v22 = vld [vmem:[#allocation2 + $0x100] sm:$0xff]  }
 0x148   : > { %v920_v54 = vadd.f32 1.0, %v2666_v60  ;;  %1978 = vmatpush3.bf16.msra.mxu1 %v2094_v63  ;;  %v2847_v39 = vpop.eup %2173  ;;  %v2849_v3 = vmul.f32 0.5, %v906_v27  ;;  %2181 = vtanh.f32 %v829_v5  ;;  %v835_v48 = vmul.f32 0.7978846, %v787_v1  ;;  %v605_v63 = vpop.f32.mrf.mxu0 }
 0x149   : > { %v1053_v29 = vpack.c.bf16 %v1023_v62, %v1017_v49  ;;  %1979 = vmatprep.subr.bf16.mxu1 %v2095_v51  ;;  %v1019_v61 = vmul.f32 %v971_v52, %v2998_v16  ;;  %v1025_v33 = vmul.f32 %v977_v4, %v2999_v26  ;;  %v649_v10 = vmul.f32 %v2844_v9, %v2844_v9  ;;  %v3002_v49 = vld [vmem:[#allocation8_spill] sm:$0xff]  ;;  %v3003_v62 = vld [vmem:[#allocation6_spill] sm:$0xff] }
 0x14a   : > { %v926_v60 = vadd.f32 1.0, %v2698_v0  ;;  %v834_v55 = vmul.f32 0.7978846, %v786_v45  ;;  %v2857_v30 = vadd.f32 %v744_v21, %v2819_v12  ;;  %v968_v11 = vmul.f32 0.5, %v920_v54  ;;  %v3001_v0 = vld [vmem:[#allocation5_spill] sm:$0xff] }
 0x14b   : > { %1503 = vmatprep.mubr.bf16.mxu1 %v1053_v29  ;;  %v922_v38 = vadd.f32 1.0, %v2674_v15  ;;  %v1055_v27 = vpack.c.bf16 %v1025_v33, %v1019_v61  ;;  %v697_v5 = vmul.f32 %v649_v10, %v2844_v9  ;;  %v928_v43 = vadd.f32 1.0, %v3000_v50 }
 0x14c   : > { %v974_v35 = vmul.f32 0.5, %v926_v60  ;;  %1980 = vmatpush3.bf16.msra.mxu1 %v2096_v20  ;;  %v2862_v25 = vpop.eup %2175  ;;  %2183 = vtanh.f32 %v835_v48  ;;  %v1016_v47 = vmul.f32 %v968_v11, %v3001_v0  ;;  %v2866_v45 = vadd.f32 %v603_v37, %v2508_v32  ;;  %v3004_v48 = vld [vmem:[#allocation9_spill] sm:$0xff] }
 0x14d   : > { %v970_v51 = vmul.f32 0.5, %v922_v38  ;;  %1981 = vmatprep.subr.bf16.mxu1 %v2097_v42  ;;  %1568 = vmatprep.mubr.bf16.mxu0 %v1055_v27  ;;  %v745_v15 = vmul.f32 0.044715, %v697_v5  ;;  %v976_v1 = vmul.f32 0.5, %v928_v43  ;;  %v2870_v21 = vadd.f32 %v605_v63, %v2512_v40  ;;  %v3005_v38 = vld [vmem:[#allocation13_spill] sm:$0xff] }
 0x14e   : > { %v1022_v36 = vmul.f32 %v974_v35, %v3002_v49  ;;  %v654_v4 = vmul.f32 %v2866_v45, %v2866_v45  ;;  %v933_v54 = vadd.f32 1.0, %v2753_v18  ;;  %v939_v20 = vadd.f32 1.0, %v2792_v2  ;;  %v3006_v27 = vld [vmem:[#allocation17_spill] sm:$0xff] }
 0x14f   : > { %v1018_v52 = vmul.f32 %v970_v51, %v3003_v62  ;;  %v793_v32 = vadd.f32 %v745_v15, %v2844_v9  ;;  %v1024_v29 = vmul.f32 %v976_v1, %v3004_v48  ;;  %v655_v42 = vmul.f32 %v2870_v21, %v2870_v21  ;;  %v3007_v51 = vld [vmem:[#allocation14_spill] sm:$0xff] }
 0x150   : > { %v1052_v37 = vpack.c.bf16 %v1022_v36, %v1016_v47  ;;  %1982 = vmatpush3.bf16.msra.mxu1 %v2098_v22  ;;  %v702_v40 = vmul.f32 %v654_v4, %v2866_v45  ;;  %v981_v16 = vmul.f32 0.5, %v933_v54  ;;  %v987_v61 = vmul.f32 0.5, %v939_v20  ;;  %v3008_v1 = vld [vmem:[#allocation18_spill] sm:$0xff] }
 0x151   : > { %v935_v26 = vadd.f32 1.0, %v2762_v6  ;;  %v841_v33 = vmul.f32 0.7978846, %v793_v32  ;;  %v1054_v18 = vpack.c.bf16 %v1024_v29, %v1018_v52  ;;  %v703_v2 = vmul.f32 %v655_v42, %v2870_v21  ;;  %v3010_v42 = vld [vmem:[#allocation15_spill] sm:$0xff] }
 0x152   : > { %1504 = vmatmul.mubr.bf16.gmra.mxu1 %v1052_v37  ;;  %v941_v10 = vadd.f32 1.0, %v2828_v7  ;;  %v2178_v60 = vpop.eup %2177  ;;  %v750_v11 = vmul.f32 0.044715, %v702_v40  ;;  %v1029_v63 = vmul.f32 %v981_v16, %v3005_v38  ;;  %v1035_v5 = vmul.f32 %v987_v61, %v3006_v27 }
 0x153   : > { %v983_v35 = vmul.f32 0.5, %v935_v26  ;;  %2185 = vtanh.f32 %v834_v55  ;;  %1569 = vmatmul.mubr.bf16.gmra.mxu0 %v1054_v18  ;;  %v751_v50 = vmul.f32 0.044715, %v703_v2  ;;  %v932_v6 = vadd.f32 1.0, %v2738_v28  ;;  %v3012_v2 = vld [vmem:[#allocation16_spill] sm:$0xff] }
 0x154   : > { %v989_v43 = vmul.f32 0.5, %v941_v10  ;;  %v2888_v22 = vpop.eup %2179  ;;  %v798_v0 = vadd.f32 %v750_v11, %v2866_v45  ;;  %v1059_v47 = vpack.c.bf16 %v1035_v5, %v1029_v63  ;;  %v938_v15 = vadd.f32 1.0, %v2774_v8  ;;  %v3009_v8 = vld [vmem:[#allocation11_spill] sm:$0xff] }
 0x155   : > { %v1031_v7 = vmul.f32 %v983_v35, %v3007_v51  ;;  %v2182_v49 = vpop.eup %2181  ;;  %v799_v36 = vadd.f32 %v751_v50, %v2870_v21  ;;  %v980_v55 = vmul.f32 0.5, %v932_v6  ;;  %v934_v52 = vadd.f32 1.0, %v2745_v58  ;;  %v3011_v58 = vld [vmem:[#allocation12_spill] sm:$0xff] }
 0x156   : > { %v1037_v62 = vmul.f32 %v989_v43, %v3008_v1  ;;  %2187 = vtanh.f32 %v841_v33  ;;  %1511 = vmatprep.mubr.bf16.mxu1 %v1059_v47  ;;  %v986_v28 = vmul.f32 0.5, %v938_v15  ;;  %v940_v4 = vadd.f32 1.0, %v2781_v44 }
 0x157   : > { %v901_v54 = vadd.f32 1.0, %v2832_v24  ;;  %v846_v20 = vmul.f32 0.7978846, %v798_v0  ;;  %v847_v32 = vmul.f32 0.7978846, %v799_v36  ;;  %v982_v48 = vmul.f32 0.5, %v934_v52 }
 0x158   : > { %v1061_v37 = vpack.c.bf16 %v1037_v62, %v1031_v7  ;;  %v1028_v29 = vmul.f32 %v980_v55, %v3009_v8  ;;  %v1034_v40 = vmul.f32 %v986_v28, %v3010_v42  ;;  %v988_v16 = vmul.f32 0.5, %v940_v4  ;;  %v3013_v7 = vld [vmem:[#allocation19_spill] sm:$0xff] }
 0x159   : > { %v907_v61 = vadd.f32 1.0, %v2837_v53  ;;  %v2184_v26 = vpop.eup %2183  ;;  %2189 = vtanh.f32 %v847_v32  ;;  %v1030_v33 = vmul.f32 %v982_v48, %v3011_v58  ;;  %v949_v18 = vmul.f32 0.5, %v901_v54 }
 0x15a   : > { %1576 = vmatprep.mubr.bf16.mxu0 %v1061_v37  ;;  %v913_v44 = vadd.f32 1.0, %v2847_v39  ;;  %v1058_v24 = vpack.c.bf16 %v1034_v40, %v1028_v29  ;;  %v1036_v10 = vmul.f32 %v988_v16, %v3012_v2  ;;  %v919_v38 = vadd.f32 1.0, %v2178_v60 }
 0x15b   : > { %v955_v11 = vmul.f32 0.5, %v907_v61  ;;  %v948_v63 = vmul.f32 0.5, %v2794_v59  ;;  %v840_v27 = vmul.f32 0.7978846, %v2857_v30  ;;  %v997_v35 = vmul.f32 %v949_v18, %v2679_v19 }
 0x15c   : > { %v961_v5 = vmul.f32 0.5, %v913_v44  ;;  %1512 = vmatmul.mubr.bf16.gmra.mxu1 %v1058_v24  ;;  %v1060_v53 = vpack.c.bf16 %v1036_v10, %v1030_v33  ;;  %v967_v43 = vmul.f32 0.5, %v919_v38  ;;  %v1002_v39 = vmul.f32 %v2849_v3, %v2696_v14 }
 0x15d   : > { %v1003_v50 = vmul.f32 %v955_v11, %v2702_v13  ;;  %v931_v6 = vadd.f32 1.0, %v2184_v26  ;;  %2191 = vtanh.f32 %v846_v20  ;;  %v918_v59 = vadd.f32 1.0, %v2862_v25 }
 0x15e   : > { %1577 = vmatmul.mubr.bf16.gmra.mxu0 %v1060_v53  ;;  %v1015_v60 = vmul.f32 %v967_v43, %v2751_v57  ;;  %v1009_v30 = vmul.f32 %v961_v5, %v2734_v31  ;;  %v925_v47 = vadd.f32 1.0, %v2182_v49  ;;  %v996_v19 = vmul.f32 %v948_v63, %v3013_v7 }
 0x15f   : > { %v1045_v0 = vpack.c.bf16 %v1003_v50, %v997_v35  ;;  %2193 = vtanh.f32 %v840_v27  ;;  %v912_v13 = vadd.f32 1.0, %v2841_v46  ;;  %v979_v14 = vmul.f32 0.5, %v931_v6  ;;  %v3014_v46 = vld [vmem:[#allocation20_spill] sm:$0xff] }
 0x160   : > { %v2186_v51 = vpop.eup %2185  ;;  %v1051_v15 = vpack.c.bf16 %v1015_v60, %v1009_v30  ;;  %v1044_v3 = vpack.c.bf16 %v1002_v39, %v996_v19  ;;  %v966_v36 = vmul.f32 0.5, %v918_v59  ;;  %v973_v62 = vmul.f32 0.5, %v925_v47 }
 0x161   : > { %1617 = vmatprep.mubr.bf16.mxu1 %v1045_v0  ;;  %v960_v57 = vmul.f32 0.5, %v912_v13  ;;  %v1027_v25 = vmul.f32 %v979_v14, %v2810_v17  ;;  %v930_v55 = vadd.f32 1.0, %v2186_v51  ;;  %v924_v20 = vadd.f32 1.0, %v2888_v22 }
 0x162   : > { %v1014_v49 = vmul.f32 %v966_v36, %v2743_v23  ;;  %v1021_v52 = vmul.f32 %v973_v62, %v2790_v34 }
 0x163   : > { %v2188_v1 = vpop.eup %2187  ;;  %v1008_v54 = vmul.f32 %v960_v57, %v3014_v46  ;;  %v978_v8 = vmul.f32 0.5, %v930_v55  ;;  %v972_v17 = vmul.f32 0.5, %v924_v20 }
 0x164   : > { %1618 = vmatmul.mubr.bf16.vlgmr.msra.gmra.mxu1 %v1044_v3  ;;  %v937_v28 = vadd.f32 1.0, %v2188_v1  ;;  %v1057_v32 = vpack.c.bf16 %v1027_v25, %v1021_v52 }
 0x165   : > { %1625 = vmatprep.mubr.bf16.mxu1 %v1051_v15  ;;  %v1050_v48 = vpack.c.bf16 %v1014_v49, %v1008_v54  ;;  %v1026_v34 = vmul.f32 %v978_v8, %v2805_v56  ;;  %v1020_v26 = vmul.f32 %v972_v17, %v2760_v41  ;;  %v2931_v15 = vld [vmem:[%s2960_s4] ss:$0 sm:$0xff] }
 0x166   : > { %v2190_v31 = vpop.eup %2189  ;;  %v985_v42 = vmul.f32 0.5, %v937_v28 }
 0x167   : > { %v943_v4 = vadd.f32 1.0, %v2190_v31  ;;  %v1056_v33 = vpack.c.bf16 %v1026_v34, %v1020_v26 }
 0x168   : > { %v1033_v61 = vmul.f32 %v985_v42, %v2844_v9 }
 0x169   : > { %v991_v37 = vmul.f32 0.5, %v943_v4 }
 0x16a   : > { %v2192_v29 = vpop.eup %2191 }
 0x16b   : > { %v1039_v23 = vmul.f32 %v991_v37, %v2870_v21  ;;  %v942_v16 = vadd.f32 1.0, %v2192_v29 }
 0x16c   : > { %1626 = vmatmul.mubr.bf16.gmra.mxu1 %v1050_v48  ;;  %v2194_v40 = vpop.eup %2193 }
 0x16d   : > { %1633 = vmatprep.mubr.bf16.mxu1 %v1057_v32  ;;  %v936_v22 = vadd.f32 1.0, %v2194_v40  ;;  %v1063_v58 = vpack.c.bf16 %v1039_v23, %v1033_v61  ;;  %v990_v18 = vmul.f32 0.5, %v942_v16 }
 0x16f   : > { %v984_v44 = vmul.f32 0.5, %v936_v22  ;;  %v1038_v24 = vmul.f32 %v990_v18, %v2866_v45 }
 0x171   : > { %v1032_v2 = vmul.f32 %v984_v44, %v2819_v12 }
 0x173   : > { %v1062_v10 = vpack.c.bf16 %v1038_v24, %v1032_v2 }
 0x174   : > { %1634 = vmatmul.mubr.bf16.gmra.mxu1 %v1056_v33 }
 0x175   : > { %1641 = vmatprep.mubr.bf16.mxu1 %v1063_v58 }
 0x17c   : > { %1642 = vmatmul.mubr.bf16.gmra.mxu1 %v1062_v10 }
 0x1f3   : > { %v1903_v21 = vpop.f32.mrf.mxu1 }
 0x1f5   : > { %v1904_v56 = vpop.f32.mrf.mxu1  ;;  %v1943_v9 = vpop.f32.mrf.mxu0 }
 0x1f6   : > { %v1905_v7 = vadd.f32 %v1904_v56, %v1903_v21 }
 0x1f7   : > { %v1906_v11 = vpop.f32.mrf.mxu1  ;;  %v1944_v27 = vpop.f32.mrf.mxu0 }
 0x1f8   : > { %v1490_v36 = vadd.f32 %v1905_v7, %v2931_v15  ;;  %v1945_v25 = vadd.f32 %v1944_v27, %v1943_v9 }
 0x1f9   : > { %v1907_v38 = vpop.f32.mrf.mxu1  ;;  %v1946_v53 = vpop.f32.mrf.mxu0 }
 0x1fa   : > { %v1908_v14 = vadd.f32 %v1907_v38, %v1906_v11  ;;  %v1555_v52 = vadd.f32 %v1945_v25, %v1490_v36 }
 0x1fb   : > { %v1947_v50 = vpop.f32.mrf.mxu0 }
 0x1fc   : > { %v1493_v57 = vadd.f32 %v1908_v14, %v2931_v15  ;;  %v1948_v49 = vadd.f32 %v1947_v50, %v1946_v53 }
 0x1fe   : > { %v1558_v46 = vadd.f32 %v1948_v49, %v1493_v57 }
 0x203   : > { %v1909_v63 = vpop.f32.mrf.mxu1 }
 0x204   : > { %v1949_v39 = vpop.f32.mrf.mxu0 }
 0x205   : > { %v1910_v41 = vpop.f32.mrf.mxu1 }
 0x206   : > { %v1950_v0 = vpop.f32.mrf.mxu0  ;;  %v1911_v54 = vadd.f32 %v1910_v41, %v1909_v63 }
 0x207   : > { %v1912_v5 = vpop.f32.mrf.mxu1  ;;  %v1951_v16 = vadd.f32 %v1950_v0, %v1949_v39 }
 0x208   : > { %v1952_v60 = vpop.f32.mrf.mxu0  ;;  %v1498_v17 = vadd.f32 %v1911_v54, %v2931_v15 }
 0x209   : > { %v1913_v35 = vpop.f32.mrf.mxu1 }
 0x20a   : > { %v1953_v30 = vpop.f32.mrf.mxu0  ;;  %v1914_v20 = vadd.f32 %v1913_v35, %v1912_v5  ;;  %v1563_v18 = vadd.f32 %v1951_v16, %v1498_v17 }
 0x20b   : > { %v1954_v61 = vadd.f32 %v1953_v30, %v1952_v60 }
 0x20c   : > { %v1501_v40 = vadd.f32 %v1914_v20, %v2931_v15 }
 0x20e   : > { %v1566_v44 = vadd.f32 %v1954_v61, %v1501_v40 }
 0x212   : > { %v1915_v43 = vpop.f32.mrf.mxu1 }
 0x213   : > { %v1955_v19 = vpop.f32.mrf.mxu0 }
 0x214   : > { %v1916_v6 = vpop.f32.mrf.mxu1 }
 0x215   : > { %v1956_v1 = vpop.f32.mrf.mxu0  ;;  %v1917_v22 = vadd.f32 %v1916_v6, %v1915_v43 }
 0x216   : > { %v1918_v45 = vpop.f32.mrf.mxu1  ;;  %v1957_v27 = vadd.f32 %v1956_v1, %v1955_v19 }
 0x217   : > { %v1958_v28 = vpop.f32.mrf.mxu0  ;;  %v1506_v11 = vadd.f32 %v1917_v22, %v2931_v15 }
 0x218   : > { %v1919_v12 = vpop.f32.mrf.mxu1 }
 0x219   : > { %v1959_v29 = vpop.f32.mrf.mxu0  ;;  %v1920_v24 = vadd.f32 %v1919_v12, %v1918_v45  ;;  %v1571_v50 = vadd.f32 %v1957_v27, %v1506_v11 }
 0x21a   : > { %v1960_v53 = vadd.f32 %v1959_v29, %v1958_v28 }
 0x21b   : > { %v1509_v63 = vadd.f32 %v1920_v24, %v2931_v15 }
 0x21c   : > { %v2926_v59 = vpop.f32.mrf.mxu1 }
 0x21d   : > { %v1574_v6 = vadd.f32 %v1960_v53, %v1509_v63 }
 0x21e   : > { %v1922_v47 = vpop.f32.mrf.mxu1  ;;  %v1961_v58 = vpop.f32.mrf.mxu0 }
 0x21f   : > { %v1923_v45 = vadd.f32 %v1922_v47, %v2926_v59 }
 0x220   : > { %v1924_v51 = vpop.f32.mrf.mxu1  ;;  %v1962_v38 = vpop.f32.mrf.mxu0 }
 0x221   : > { %v1514_v19 = vadd.f32 %v1923_v45, %v2931_v15  ;;  %v1963_v57 = vadd.f32 %v1962_v38, %v1961_v58 }
 0x222   : > { %v1925_v13 = vpop.f32.mrf.mxu1  ;;  %v1964_v43 = vpop.f32.mrf.mxu0 }
 0x223   : > { %v1926_v0 = vadd.f32 %v1925_v13, %v1924_v51  ;;  %v1579_v59 = vadd.f32 %v1963_v57, %v1514_v19 }
 0x224   : > { %v1983_v3 = vpop.f32.mrf.mxu1  ;;  %v1965_v14 = vpop.f32.mrf.mxu0 }
 0x225   : > { %v1517_v36 = vadd.f32 %v1926_v0, %v2931_v15  ;;  %v1966_v25 = vadd.f32 %v1965_v14, %v1964_v43 }
 0x226   : > { %v1984_v62 = vpop.f32.mrf.mxu1 }
 0x227   : > { %v1985_v55 = vadd.f32 %v1984_v62, %v1983_v3  ;;  %v1582_v47 = vadd.f32 %v1966_v25, %v1517_v36 }
 0x228   : > { %v1986_v31 = vpop.f32.mrf.mxu1 }
 0x229   : > { %v1620_v48 = vadd.f32 %v1985_v55, %v1555_v52 }
 0x22a   : > { %v1987_v4 = vpop.f32.mrf.mxu1 }
 0x22b   : > { %v1988_v32 = vadd.f32 %v1987_v4, %v1986_v31 }
 0x22c   : > { %v1989_v37 = vpop.f32.mrf.mxu1 }
 0x22d   : > { %v1623_v8 = vadd.f32 %v1988_v32, %v1558_v46 }
 0x22e   : > { %v1990_v42 = vpop.f32.mrf.mxu1 }
 0x22f   : > { %v1867_v23 = vpack.c.bf16 %v1623_v8, %v1620_v48  ;;  %v1991_v26 = vadd.f32 %v1990_v42, %v1989_v37 }
 0x230   : > { %v1992_v34 = vpop.f32.mrf.mxu1 }
 0x231   : > { %1868 = vst [vmem:[%s2940_s17] sm:$0xff] %v1867_v23   ;;  %v1628_v21 = vadd.f32 %v1991_v26, %v1563_v18 }
 0x232   : > { %v1993_v33 = vpop.f32.mrf.mxu1 }
 0x233   : > { %v1994_v2 = vadd.f32 %v1993_v33, %v1992_v34 }
 0x234   : > { %v1995_v10 = vpop.f32.mrf.mxu1 }
 0x235   : > { %v1631_v56 = vadd.f32 %v1994_v2, %v1566_v44 }
 0x236   : > { %v1996_v9 = vpop.f32.mrf.mxu1 }
 0x237   : > { %v1872_v41 = vpack.c.bf16 %v1631_v56, %v1628_v21  ;;  %v1997_v35 = vadd.f32 %v1996_v9, %v1995_v10 }
 0x238   : > { %v1998_v5 = vpop.f32.mrf.mxu1 }
 0x239   : > { %1884 = vst [vmem:[%s2940_s17 + $0x8] sm:$0xff] %v1872_v41   ;;  %v1636_v30 = vadd.f32 %v1997_v35, %v1571_v50 }
 0x23a   : > { %v1999_v39 = vpop.f32.mrf.mxu1 }
 0x23b   : > { %v2000_v12 = vadd.f32 %v1999_v39, %v1998_v5 }
 0x23c   : > { %v2001_v60 = vpop.f32.mrf.mxu1 }
 0x23d   : > { %v1639_v7 = vadd.f32 %v2000_v12, %v1574_v6 }
 0x23e   : > { %v2002_v3 = vpop.f32.mrf.mxu1 }
 0x23f   : > { %v1877_v1 = vpack.c.bf16 %v1639_v7, %v1636_v30  ;;  %v2003_v31 = vadd.f32 %v2002_v3, %v2001_v60 }
 0x240   : > { %v2004_v62 = vpop.f32.mrf.mxu1 }
 0x241   : > { %1885 = vst [vmem:[%s2940_s17 + $0x10] sm:$0xff] %v1877_v1   ;;  %v1644_v13 = vadd.f32 %v2003_v31, %v1579_v59 }
 0x242   : > { %v2005_v49 = vpop.f32.mrf.mxu1 }
 0x243   : > { %v2006_v51 = vadd.f32 %v2005_v49, %v2004_v62 }
 0x245   : > { %v1647_v55 = vadd.f32 %v2006_v51, %v1582_v47 }
 0x247   : > { %v1882_v52 = vpack.c.bf16 %v1647_v55, %v1644_v13 }
 0x249   : > { %1886 = vst [vmem:[%s2940_s17 + $0x18] sm:$0xff] %v1882_v52  }
 0x24a PF: > { %s16_s18 = sadd.s32 1, %s2231_s18  }
 0x24b   : > { %p13_p1 = scmp.ge.s32.totalorder %s16_s18, 4  }
 0x24d   :  { %15 = sbr.rel (!%p13_p1) target bundleno = 1 (0x1), region = 75 }
 0x252   :  { %1712 = vsyncpa [#allocation3], 1 }
 0x253   :  { %1714 = vsyncpa [#allocation3 + $0x1], 1 }

</bundles_post_ra>
